<compile_context>
chip_gen: v6e
topology: v6e:2x2x1
jax: 0.10.0
libtpu: 0.0.40
codegen_flags: <defaults>
</compile_context>

<pallas_src>
import jax
import jax.numpy as jnp
from jax.experimental import pallas as pl
from jax.experimental.pallas import tpu as pltpu

EMBEDDING_DIM = 64
H_DIM = 64
NUM_LAYERS = 1


def _encoder_kernel(xf_ref, wx_ref, whh_ref, b_ref, out_ref, zx_sc):
    sb = xf_ref.shape[0]             # seq * batch
    batch = out_ref.shape[1]
    h_dim = out_ref.shape[2]
    seq = sb // batch

    # --- Hoisted, fused input projection for ALL timesteps (one MXU dot, one
    # lane-dense (seq*batch, 4h) scratch; embedding + LSTM biases pre-folded).
    zx_sc[...] = (
        jnp.dot(xf_ref[...], wx_ref[...], preferred_element_type=jnp.float32)
        + b_ref[...]
    )

    # Recurrent weights: loaded once, resident across the unrolled loop.
    w_hh = whh_ref[...]              # (h, 4h), columns ordered [i, f, g, o]

    # Constant lane mask for the packed 2h-wide gate pairs (hoisted: JAX does
    # not CSE broadcast_in_dim inside the unrolled loop).
    lane = jax.lax.broadcasted_iota(jnp.int32, (batch, 2 * h_dim), 1)
    first_half = lane < h_dim        # lanes [0, h) of a [x|y] pair

    def step(t, hc):
        # hc = [h | c] packed in one 128-lane vreg per sublane block.
        h_prev = hc[:, :h_dim]                       # lane offset 0: no rotate
        row = pl.multiple_of(t * batch, batch)
        z = zx_sc[pl.ds(row, batch), :] + jnp.dot(
            h_prev, w_hh, preferred_element_type=jnp.float32)   # (batch, 4h)

        z_if = z[:, : 2 * h_dim]                     # [z_i | z_f] (vreg-aligned)
        z_go = z[:, 2 * h_dim:]                      # [z_g | z_o] (vreg-aligned)

        act_if = jax.nn.sigmoid(z_if)                              # [i | f]
        act_go = jnp.where(first_half, jnp.tanh(z_go),
                           jax.nn.sigmoid(z_go))                   # [g | o]

        # c_new = i*g + f*c, built in the high lane-half:
        ig_fo = act_if * act_go                      # [i*g  | f*o ]
        ih_fc = act_if * hc                          # [i*h  | f*c ]
        p = ih_fc + pltpu.roll(ig_fo, shift=h_dim, axis=1)   # [junk | c_new]
        # h_new = o * tanh(c_new), also in the high lane-half:
        q = act_go * jnp.tanh(p)                              # [junk | h_new]
        # Repack next state as [h_new | c_new].
        return jnp.where(first_half, pltpu.roll(q, shift=h_dim, axis=1), p)

    hc0 = jnp.zeros((batch, 2 * h_dim), jnp.float32)
    hc_final = jax.lax.fori_loop(0, seq, step, hc0, unroll=True)

    out_ref[0] = hc_final[:, :h_dim].astype(out_ref.dtype)


def encoder_forward(obs_traj, w_emb, b_emb, w_ih, w_hh, b_gates):
    """obs_traj: (seq, batch, 2) f32 -> final_h: (1, batch, h_dim) f32.

    Parameter layout (pre-transposed vs torch so the kernel does x @ W):
      w_emb: (2, emb)   b_emb: (1, emb)
      w_ih:  (emb, 4h)  w_hh:  (h, 4h)  b_gates: (1, 4h)  -- [i, f, g, o] columns.
    """
    seq_len, batch, two = obs_traj.shape
    assert two == 2
    h4 = w_ih.shape[1]
    h = h4 // 4
    assert w_hh.shape == (h, h4)

    # Fold the (linear, no-activation) spatial embedding into the input
    # projection.  HIGHEST precision: tiny one-time fold, keeps the FP
    # association close to (x @ W_emb) @ W_ih of the reference.
    hp = jax.lax.Precision.HIGHEST
    w_x = jnp.dot(w_emb, w_ih, precision=hp)                 # (2, 4h)
    b_fold = jnp.dot(b_emb, w_ih, precision=hp) + b_gates    # (1, 4h)

    # Flatten time into rows so the hoisted x-projection is one big matmul.
    xf = obs_traj.reshape(seq_len * batch, 2)

    grid_spec = pltpu.PrefetchScalarGridSpec(
        num_scalar_prefetch=0,
        grid=(1,),  # single invocation: whole recurrence lives inside the kernel
        in_specs=[
            pl.BlockSpec((seq_len * batch, 2), lambda i: (0, 0)),   # X (flattened)
            pl.BlockSpec((2, h4), lambda i: (0, 0)),                # fused W_x
            pl.BlockSpec((h, h4), lambda i: (0, 0)),                # fused W_hh
            pl.BlockSpec((1, h4), lambda i: (0, 0)),                # fused bias
        ],
        out_specs=pl.BlockSpec((NUM_LAYERS, batch, h), lambda i: (0, 0, 0)),
        scratch_shapes=[pltpu.VMEM((seq_len * batch, h4), jnp.float32)],
    )

    # TODO(synk): for real Social GAN pedestrian batches (100s-1000s), add a
    # leading "parallel" batch-tile grid axis (shares work across v7x's two
    # TensorCores) and size the per-tile zx scratch for v7x's 64 MiB VMEM
    # (batch_tile ~ 2k at seq=8); at batch=8 a single invocation is optimal.
    return pl.pallas_call(
        _encoder_kernel,
        out_shape=jax.ShapeDtypeStruct((NUM_LAYERS, batch, h), jnp.float32),
        grid_spec=grid_spec,
        compiler_params=pltpu.CompilerParams(dimension_semantics=("arbitrary",)),
    )(xf, w_x, w_hh, b_fold)


def encoder_reference(obs_traj, w_emb, b_emb, w_ih, w_hh, b_gates):
    """Pure-JAX reference of the same forward pass (for correctness check)."""
    seq_len, batch, _ = obs_traj.shape
    h_dim = w_hh.shape[0]
    emb = obs_traj.reshape(-1, 2) @ w_emb + b_emb[0]
    emb = emb.reshape(seq_len, batch, -1)

    def step(carry, x_t):
        h, c = carry
        z = x_t @ w_ih + h @ w_hh + b_gates[0]
        i_g = jax.nn.sigmoid(z[:, 0 * h_dim:1 * h_dim])
        f_g = jax.nn.sigmoid(z[:, 1 * h_dim:2 * h_dim])
        g_g = jnp.tanh(z[:, 2 * h_dim:3 * h_dim])
        o_g = jax.nn.sigmoid(z[:, 3 * h_dim:4 * h_dim])
        c_new = f_g * c + i_g * g_g
        h_new = o_g * jnp.tanh(c_new)
        return (h_new, c_new), None

    h0 = jnp.zeros((batch, h_dim), jnp.float32)
    c0 = jnp.zeros((batch, h_dim), jnp.float32)
    (h_final, _), _ = jax.lax.scan(step, (h0, c0), emb)
    return h_final[None]  # (1, batch, h_dim)


if __name__ == "__main__":
    key = jax.random.PRNGKey(0)
    k_x, k_we, k_be, k_wi, k_wh, k_bi, k_bh = jax.random.split(key, 7)

    seq_len, batch = 8, 8

    # Deterministic synthetic parameters (shapes match the PyTorch module).
    obs_traj = jax.random.normal(k_x, (seq_len, batch, 2), jnp.float32)

    w_emb = jax.random.normal(k_we, (2, EMBEDDING_DIM), jnp.float32) * 0.5
    b_emb = jax.random.normal(k_be, (1, EMBEDDING_DIM), jnp.float32) * 0.1

    # PyTorch stores W_ih as (4*h, emb); we pre-transpose so the kernel does x @ W.
    w_ih = jax.random.normal(k_wi, (EMBEDDING_DIM, 4 * H_DIM), jnp.float32) * 0.1
    w_hh = jax.random.normal(k_wh, (H_DIM, 4 * H_DIM), jnp.float32) * 0.1
    b_gates = (jax.random.normal(k_bi, (1, 4 * H_DIM), jnp.float32) * 0.1
               + jax.random.normal(k_bh, (1, 4 * H_DIM), jnp.float32) * 0.1)

    final_h = encoder_forward(obs_traj, w_emb, b_emb, w_ih, w_hh, b_gates)
    final_h = jax.block_until_ready(final_h)

    ref = encoder_reference(obs_traj, w_emb, b_emb, w_ih, w_hh, b_gates)
    assert final_h.shape == (NUM_LAYERS, batch, H_DIM)
    assert jnp.allclose(final_h, ref, atol=1e-4, rtol=1e-4)

    print("KERNEL_OK")
</pallas_src>

<mosaic_0001>
module attributes {stable_mosaic.version = 11 : i64} {
  func.func @_encoder_kernel(%arg0: i32, %arg1: memref<64x2xf32, #tpu.memory_space<vmem>>, %arg2: memref<2x256xf32, #tpu.memory_space<vmem>>, %arg3: memref<64x256xf32, #tpu.memory_space<vmem>>, %arg4: memref<1x256xf32, #tpu.memory_space<vmem>>, %arg5: memref<1x8x64xf32, #tpu.memory_space<vmem>>, %arg6: memref<64x256xf32, #tpu.memory_space<vmem>>) attributes {dimension_semantics = [#tpu.dimension_semantics<arbitrary>], iteration_bounds = array<i64: 1>, scalar_prefetch = 0 : i64, scratch_operands = 1 : i64, tpu.core_type = #tpu.core_type<tc>, window_params = [{pipeline_mode = #tpu.pipeline_mode<synchronous>, transform_indices = @transform_0, window_bounds = array<i64: 64, 2>}, {pipeline_mode = #tpu.pipeline_mode<synchronous>, transform_indices = @transform_1, window_bounds = array<i64: 2, 256>}, {pipeline_mode = #tpu.pipeline_mode<synchronous>, transform_indices = @transform_2, window_bounds = array<i64: 64, 256>}, {pipeline_mode = #tpu.pipeline_mode<synchronous>, transform_indices = @transform_3, window_bounds = array<i64: 1, 256>}, {pipeline_mode = #tpu.pipeline_mode<synchronous>, transform_indices = @transform_4, window_bounds = array<i64: 1, 8, 64>}]} {
    %c0 = arith.constant 0 : index
    %c0_0 = arith.constant 0 : index
    %0 = vector.load %arg1[%c0, %c0_0] : memref<64x2xf32, #tpu.memory_space<vmem>>, vector<64x2xf32>
    %c0_1 = arith.constant 0 : index
    %c0_2 = arith.constant 0 : index
    %1 = vector.load %arg2[%c0_1, %c0_2] : memref<2x256xf32, #tpu.memory_space<vmem>>, vector<2x256xf32>
    %cst = arith.constant dense<0.000000e+00> : vector<64x256xf32>
    %2 = tpu.matmul %0, %1, %cst {dimension_numbers = #tpu.dot_dimension_numbers<[1], [0], [0], [1], [0, 0, 1, 1], [], []>} : vector<64x2xf32>, vector<2x256xf32>, vector<64x256xf32> -> vector<64x256xf32>
    %c0_3 = arith.constant 0 : index
    %c0_4 = arith.constant 0 : index
    %3 = vector.load %arg4[%c0_3, %c0_4] : memref<1x256xf32, #tpu.memory_space<vmem>>, vector<1x256xf32>
    %4 = vector.broadcast %3 : vector<1x256xf32> to vector<64x256xf32>
    %5 = arith.addf %2, %4 : vector<64x256xf32>
    %c0_5 = arith.constant 0 : index
    %c0_6 = arith.constant 0 : index
    %6 = vector.load %arg6[%c0_5, %c0_6] : memref<64x256xf32, #tpu.memory_space<vmem>>, vector<64x256xf32>
    tpu.vector_store %arg6[%c0_5, %c0_6], %5 {strides = array<i32>} : memref<64x256xf32, #tpu.memory_space<vmem>>, vector<64x256xf32>,
    %c0_7 = arith.constant 0 : index
    %c0_8 = arith.constant 0 : index
    %7 = vector.load %arg3[%c0_7, %c0_8] : memref<64x256xf32, #tpu.memory_space<vmem>>, vector<64x256xf32>
    %8 = tpu.iota {dimensions = array<i32: 1>} : vector<8x128xi32>
    %c64_i32 = arith.constant 64 : i32
    %9 = vector.broadcast %c64_i32 : i32 to vector<8x128xi32>
    %10 = arith.cmpi slt, %8, %9 : vector<8x128xi32>
    %cst_9 = arith.constant 0.000000e+00 : f32
    %11 = vector.broadcast %cst_9 : f32 to vector<8x128xf32>
    %c0_i32 = arith.constant 0 : i32
    %12 = vector.extract_strided_slice %11 {offsets = [0, 0], sizes = [8, 64], strides = [1, 1]} : vector<8x128xf32> to vector<8x64xf32>
    %c8_i32 = arith.constant 8 : i32
    %13 = arith.muli %c0_i32, %c8_i32 : i32
    %14 = tpu.assume_multiple %13, 8 : i32
    %15 = arith.index_cast %14 : i32 to index
    %c0_10 = arith.constant 0 : index
    %16 = vector.load %arg6[%15, %c0_10] : memref<64x256xf32, #tpu.memory_space<vmem>>, vector<8x256xf32>
    %cst_11 = arith.constant dense<0.000000e+00> : vector<8x256xf32>
    %17 = tpu.matmul %12, %7, %cst_11 {dimension_numbers = #tpu.dot_dimension_numbers<[1], [0], [0], [1], [0, 0, 1, 1], [], []>} : vector<8x64xf32>, vector<64x256xf32>, vector<8x256xf32> -> vector<8x256xf32>
    %18 = arith.addf %16, %17 : vector<8x256xf32>
    %19 = vector.extract_strided_slice %18 {offsets = [0, 0], sizes = [8, 128], strides = [1, 1]} : vector<8x256xf32> to vector<8x128xf32>
    %20 = vector.extract_strided_slice %18 {offsets = [0, 128], sizes = [8, 128], strides = [1, 1]} : vector<8x256xf32> to vector<8x128xf32>
    %21 = arith.negf %19 : vector<8x128xf32>
    %22 = math.exp %21 : vector<8x128xf32>
    %cst_12 = arith.constant 1.000000e+00 : f32
    %23 = vector.broadcast %cst_12 : f32 to vector<8x128xf32>
    %24 = arith.addf %23, %22 : vector<8x128xf32>
    %25 = arith.divf %23, %24 : vector<8x128xf32>
    %26 = math.tanh %20 : vector<8x128xf32>
    %27 = arith.negf %20 : vector<8x128xf32>
    %28 = math.exp %27 : vector<8x128xf32>
    %cst_13 = arith.constant 1.000000e+00 : f32
    %29 = vector.broadcast %cst_13 : f32 to vector<8x128xf32>
    %30 = arith.addf %29, %28 : vector<8x128xf32>
    %31 = arith.divf %29, %30 : vector<8x128xf32>
    %32 = arith.select %10, %26, %31 : vector<8x128xi1>, vector<8x128xf32>
    %33 = arith.mulf %25, %32 : vector<8x128xf32>
    %34 = arith.mulf %25, %11 : vector<8x128xf32>
    %c64_i32_14 = arith.constant 64 : i32
    %35 = tpu.dynamic_rotate %33 by %c64_i32_14 dim 1 : vector<8x128xf32>, i32 -> vector<8x128xf32>
    %36 = arith.addf %34, %35 : vector<8x128xf32>
    %37 = math.tanh %36 : vector<8x128xf32>
    %38 = arith.mulf %32, %37 : vector<8x128xf32>
    %c64_i32_15 = arith.constant 64 : i32
    %39 = tpu.dynamic_rotate %38 by %c64_i32_15 dim 1 : vector<8x128xf32>, i32 -> vector<8x128xf32>
    %40 = arith.select %10, %39, %36 : vector<8x128xi1>, vector<8x128xf32>
    %c1_i32 = arith.constant 1 : i32
    %41 = vector.extract_strided_slice %40 {offsets = [0, 0], sizes = [8, 64], strides = [1, 1]} : vector<8x128xf32> to vector<8x64xf32>
    %c8_i32_16 = arith.constant 8 : i32
    %42 = arith.muli %c1_i32, %c8_i32_16 : i32
    %43 = tpu.assume_multiple %42, 8 : i32
    %44 = arith.index_cast %43 : i32 to index
    %c0_17 = arith.constant 0 : index
    %45 = vector.load %arg6[%44, %c0_17] : memref<64x256xf32, #tpu.memory_space<vmem>>, vector<8x256xf32>
    %cst_18 = arith.constant dense<0.000000e+00> : vector<8x256xf32>
    %46 = tpu.matmul %41, %7, %cst_18 {dimension_numbers = #tpu.dot_dimension_numbers<[1], [0], [0], [1], [0, 0, 1, 1], [], []>} : vector<8x64xf32>, vector<64x256xf32>, vector<8x256xf32> -> vector<8x256xf32>
    %47 = arith.addf %45, %46 : vector<8x256xf32>
    %48 = vector.extract_strided_slice %47 {offsets = [0, 0], sizes = [8, 128], strides = [1, 1]} : vector<8x256xf32> to vector<8x128xf32>
    %49 = vector.extract_strided_slice %47 {offsets = [0, 128], sizes = [8, 128], strides = [1, 1]} : vector<8x256xf32> to vector<8x128xf32>
    %50 = arith.negf %48 : vector<8x128xf32>
    %51 = math.exp %50 : vector<8x128xf32>
    %cst_19 = arith.constant 1.000000e+00 : f32
    %52 = vector.broadcast %cst_19 : f32 to vector<8x128xf32>
    %53 = arith.addf %52, %51 : vector<8x128xf32>
    %54 = arith.divf %52, %53 : vector<8x128xf32>
    %55 = math.tanh %49 : vector<8x128xf32>
    %56 = arith.negf %49 : vector<8x128xf32>
    %57 = math.exp %56 : vector<8x128xf32>
    %cst_20 = arith.constant 1.000000e+00 : f32
    %58 = vector.broadcast %cst_20 : f32 to vector<8x128xf32>
    %59 = arith.addf %58, %57 : vector<8x128xf32>
    %60 = arith.divf %58, %59 : vector<8x128xf32>
    %61 = arith.select %10, %55, %60 : vector<8x128xi1>, vector<8x128xf32>
    %62 = arith.mulf %54, %61 : vector<8x128xf32>
    %63 = arith.mulf %54, %40 : vector<8x128xf32>
    %c64_i32_21 = arith.constant 64 : i32
    %64 = tpu.dynamic_rotate %62 by %c64_i32_21 dim 1 : vector<8x128xf32>, i32 -> vector<8x128xf32>
    %65 = arith.addf %63, %64 : vector<8x128xf32>
    %66 = math.tanh %65 : vector<8x128xf32>
    %67 = arith.mulf %61, %66 : vector<8x128xf32>
    %c64_i32_22 = arith.constant 64 : i32
    %68 = tpu.dynamic_rotate %67 by %c64_i32_22 dim 1 : vector<8x128xf32>, i32 -> vector<8x128xf32>
    %69 = arith.select %10, %68, %65 : vector<8x128xi1>, vector<8x128xf32>
    %c2_i32 = arith.constant 2 : i32
    %70 = vector.extract_strided_slice %69 {offsets = [0, 0], sizes = [8, 64], strides = [1, 1]} : vector<8x128xf32> to vector<8x64xf32>
    %c8_i32_23 = arith.constant 8 : i32
    %71 = arith.muli %c2_i32, %c8_i32_23 : i32
    %72 = tpu.assume_multiple %71, 8 : i32
    %73 = arith.index_cast %72 : i32 to index
    %c0_24 = arith.constant 0 : index
    %74 = vector.load %arg6[%73, %c0_24] : memref<64x256xf32, #tpu.memory_space<vmem>>, vector<8x256xf32>
    %cst_25 = arith.constant dense<0.000000e+00> : vector<8x256xf32>
    %75 = tpu.matmul %70, %7, %cst_25 {dimension_numbers = #tpu.dot_dimension_numbers<[1], [0], [0], [1], [0, 0, 1, 1], [], []>} : vector<8x64xf32>, vector<64x256xf32>, vector<8x256xf32> -> vector<8x256xf32>
    %76 = arith.addf %74, %75 : vector<8x256xf32>
    %77 = vector.extract_strided_slice %76 {offsets = [0, 0], sizes = [8, 128], strides = [1, 1]} : vector<8x256xf32> to vector<8x128xf32>
    %78 = vector.extract_strided_slice %76 {offsets = [0, 128], sizes = [8, 128], strides = [1, 1]} : vector<8x256xf32> to vector<8x128xf32>
    %79 = arith.negf %77 : vector<8x128xf32>
    %80 = math.exp %79 : vector<8x128xf32>
    %cst_26 = arith.constant 1.000000e+00 : f32
    %81 = vector.broadcast %cst_26 : f32 to vector<8x128xf32>
    %82 = arith.addf %81, %80 : vector<8x128xf32>
    %83 = arith.divf %81, %82 : vector<8x128xf32>
    %84 = math.tanh %78 : vector<8x128xf32>
    %85 = arith.negf %78 : vector<8x128xf32>
    %86 = math.exp %85 : vector<8x128xf32>
    %cst_27 = arith.constant 1.000000e+00 : f32
    %87 = vector.broadcast %cst_27 : f32 to vector<8x128xf32>
    %88 = arith.addf %87, %86 : vector<8x128xf32>
    %89 = arith.divf %87, %88 : vector<8x128xf32>
    %90 = arith.select %10, %84, %89 : vector<8x128xi1>, vector<8x128xf32>
    %91 = arith.mulf %83, %90 : vector<8x128xf32>
    %92 = arith.mulf %83, %69 : vector<8x128xf32>
    %c64_i32_28 = arith.constant 64 : i32
    %93 = tpu.dynamic_rotate %91 by %c64_i32_28 dim 1 : vector<8x128xf32>, i32 -> vector<8x128xf32>
    %94 = arith.addf %92, %93 : vector<8x128xf32>
    %95 = math.tanh %94 : vector<8x128xf32>
    %96 = arith.mulf %90, %95 : vector<8x128xf32>
    %c64_i32_29 = arith.constant 64 : i32
    %97 = tpu.dynamic_rotate %96 by %c64_i32_29 dim 1 : vector<8x128xf32>, i32 -> vector<8x128xf32>
    %98 = arith.select %10, %97, %94 : vector<8x128xi1>, vector<8x128xf32>
    %c3_i32 = arith.constant 3 : i32
    %99 = vector.extract_strided_slice %98 {offsets = [0, 0], sizes = [8, 64], strides = [1, 1]} : vector<8x128xf32> to vector<8x64xf32>
    %c8_i32_30 = arith.constant 8 : i32
    %100 = arith.muli %c3_i32, %c8_i32_30 : i32
    %101 = tpu.assume_multiple %100, 8 : i32
    %102 = arith.index_cast %101 : i32 to index
    %c0_31 = arith.constant 0 : index
    %103 = vector.load %arg6[%102, %c0_31] : memref<64x256xf32, #tpu.memory_space<vmem>>, vector<8x256xf32>
    %cst_32 = arith.constant dense<0.000000e+00> : vector<8x256xf32>
    %104 = tpu.matmul %99, %7, %cst_32 {dimension_numbers = #tpu.dot_dimension_numbers<[1], [0], [0], [1], [0, 0, 1, 1], [], []>} : vector<8x64xf32>, vector<64x256xf32>, vector<8x256xf32> -> vector<8x256xf32>
    %105 = arith.addf %103, %104 : vector<8x256xf32>
    %106 = vector.extract_strided_slice %105 {offsets = [0, 0], sizes = [8, 128], strides = [1, 1]} : vector<8x256xf32> to vector<8x128xf32>
    %107 = vector.extract_strided_slice %105 {offsets = [0, 128], sizes = [8, 128], strides = [1, 1]} : vector<8x256xf32> to vector<8x128xf32>
    %108 = arith.negf %106 : vector<8x128xf32>
    %109 = math.exp %108 : vector<8x128xf32>
    %cst_33 = arith.constant 1.000000e+00 : f32
    %110 = vector.broadcast %cst_33 : f32 to vector<8x128xf32>
    %111 = arith.addf %110, %109 : vector<8x128xf32>
    %112 = arith.divf %110, %111 : vector<8x128xf32>
    %113 = math.tanh %107 : vector<8x128xf32>
    %114 = arith.negf %107 : vector<8x128xf32>
    %115 = math.exp %114 : vector<8x128xf32>
    %cst_34 = arith.constant 1.000000e+00 : f32
    %116 = vector.broadcast %cst_34 : f32 to vector<8x128xf32>
    %117 = arith.addf %116, %115 : vector<8x128xf32>
    %118 = arith.divf %116, %117 : vector<8x128xf32>
    %119 = arith.select %10, %113, %118 : vector<8x128xi1>, vector<8x128xf32>
    %120 = arith.mulf %112, %119 : vector<8x128xf32>
    %121 = arith.mulf %112, %98 : vector<8x128xf32>
    %c64_i32_35 = arith.constant 64 : i32
    %122 = tpu.dynamic_rotate %120 by %c64_i32_35 dim 1 : vector<8x128xf32>, i32 -> vector<8x128xf32>
    %123 = arith.addf %121, %122 : vector<8x128xf32>
    %124 = math.tanh %123 : vector<8x128xf32>
    %125 = arith.mulf %119, %124 : vector<8x128xf32>
    %c64_i32_36 = arith.constant 64 : i32
    %126 = tpu.dynamic_rotate %125 by %c64_i32_36 dim 1 : vector<8x128xf32>, i32 -> vector<8x128xf32>
    %127 = arith.select %10, %126, %123 : vector<8x128xi1>, vector<8x128xf32>
    %c4_i32 = arith.constant 4 : i32
    %128 = vector.extract_strided_slice %127 {offsets = [0, 0], sizes = [8, 64], strides = [1, 1]} : vector<8x128xf32> to vector<8x64xf32>
    %c8_i32_37 = arith.constant 8 : i32
    %129 = arith.muli %c4_i32, %c8_i32_37 : i32
    %130 = tpu.assume_multiple %129, 8 : i32
    %131 = arith.index_cast %130 : i32 to index
    %c0_38 = arith.constant 0 : index
    %132 = vector.load %arg6[%131, %c0_38] : memref<64x256xf32, #tpu.memory_space<vmem>>, vector<8x256xf32>
    %cst_39 = arith.constant dense<0.000000e+00> : vector<8x256xf32>
    %133 = tpu.matmul %128, %7, %cst_39 {dimension_numbers = #tpu.dot_dimension_numbers<[1], [0], [0], [1], [0, 0, 1, 1], [], []>} : vector<8x64xf32>, vector<64x256xf32>, vector<8x256xf32> -> vector<8x256xf32>
    %134 = arith.addf %132, %133 : vector<8x256xf32>
    %135 = vector.extract_strided_slice %134 {offsets = [0, 0], sizes = [8, 128], strides = [1, 1]} : vector<8x256xf32> to vector<8x128xf32>
    %136 = vector.extract_strided_slice %134 {offsets = [0, 128], sizes = [8, 128], strides = [1, 1]} : vector<8x256xf32> to vector<8x128xf32>
    %137 = arith.negf %135 : vector<8x128xf32>
    %138 = math.exp %137 : vector<8x128xf32>
    %cst_40 = arith.constant 1.000000e+00 : f32
    %139 = vector.broadcast %cst_40 : f32 to vector<8x128xf32>
    %140 = arith.addf %139, %138 : vector<8x128xf32>
    %141 = arith.divf %139, %140 : vector<8x128xf32>
    %142 = math.tanh %136 : vector<8x128xf32>
    %143 = arith.negf %136 : vector<8x128xf32>
    %144 = math.exp %143 : vector<8x128xf32>
    %cst_41 = arith.constant 1.000000e+00 : f32
    %145 = vector.broadcast %cst_41 : f32 to vector<8x128xf32>
    %146 = arith.addf %145, %144 : vector<8x128xf32>
    %147 = arith.divf %145, %146 : vector<8x128xf32>
    %148 = arith.select %10, %142, %147 : vector<8x128xi1>, vector<8x128xf32>
    %149 = arith.mulf %141, %148 : vector<8x128xf32>
    %150 = arith.mulf %141, %127 : vector<8x128xf32>
    %c64_i32_42 = arith.constant 64 : i32
    %151 = tpu.dynamic_rotate %149 by %c64_i32_42 dim 1 : vector<8x128xf32>, i32 -> vector<8x128xf32>
    %152 = arith.addf %150, %151 : vector<8x128xf32>
    %153 = math.tanh %152 : vector<8x128xf32>
    %154 = arith.mulf %148, %153 : vector<8x128xf32>
    %c64_i32_43 = arith.constant 64 : i32
    %155 = tpu.dynamic_rotate %154 by %c64_i32_43 dim 1 : vector<8x128xf32>, i32 -> vector<8x128xf32>
    %156 = arith.select %10, %155, %152 : vector<8x128xi1>, vector<8x128xf32>
    %c5_i32 = arith.constant 5 : i32
    %157 = vector.extract_strided_slice %156 {offsets = [0, 0], sizes = [8, 64], strides = [1, 1]} : vector<8x128xf32> to vector<8x64xf32>
    %c8_i32_44 = arith.constant 8 : i32
    %158 = arith.muli %c5_i32, %c8_i32_44 : i32
    %159 = tpu.assume_multiple %158, 8 : i32
    %160 = arith.index_cast %159 : i32 to index
    %c0_45 = arith.constant 0 : index
    %161 = vector.load %arg6[%160, %c0_45] : memref<64x256xf32, #tpu.memory_space<vmem>>, vector<8x256xf32>
    %cst_46 = arith.constant dense<0.000000e+00> : vector<8x256xf32>
    %162 = tpu.matmul %157, %7, %cst_46 {dimension_numbers = #tpu.dot_dimension_numbers<[1], [0], [0], [1], [0, 0, 1, 1], [], []>} : vector<8x64xf32>, vector<64x256xf32>, vector<8x256xf32> -> vector<8x256xf32>
    %163 = arith.addf %161, %162 : vector<8x256xf32>
    %164 = vector.extract_strided_slice %163 {offsets = [0, 0], sizes = [8, 128], strides = [1, 1]} : vector<8x256xf32> to vector<8x128xf32>
    %165 = vector.extract_strided_slice %163 {offsets = [0, 128], sizes = [8, 128], strides = [1, 1]} : vector<8x256xf32> to vector<8x128xf32>
    %166 = arith.negf %164 : vector<8x128xf32>
    %167 = math.exp %166 : vector<8x128xf32>
    %cst_47 = arith.constant 1.000000e+00 : f32
    %168 = vector.broadcast %cst_47 : f32 to vector<8x128xf32>
    %169 = arith.addf %168, %167 : vector<8x128xf32>
    %170 = arith.divf %168, %169 : vector<8x128xf32>
    %171 = math.tanh %165 : vector<8x128xf32>
    %172 = arith.negf %165 : vector<8x128xf32>
    %173 = math.exp %172 : vector<8x128xf32>
    %cst_48 = arith.constant 1.000000e+00 : f32
    %174 = vector.broadcast %cst_48 : f32 to vector<8x128xf32>
    %175 = arith.addf %174, %173 : vector<8x128xf32>
    %176 = arith.divf %174, %175 : vector<8x128xf32>
    %177 = arith.select %10, %171, %176 : vector<8x128xi1>, vector<8x128xf32>
    %178 = arith.mulf %170, %177 : vector<8x128xf32>
    %179 = arith.mulf %170, %156 : vector<8x128xf32>
    %c64_i32_49 = arith.constant 64 : i32
    %180 = tpu.dynamic_rotate %178 by %c64_i32_49 dim 1 : vector<8x128xf32>, i32 -> vector<8x128xf32>
    %181 = arith.addf %179, %180 : vector<8x128xf32>
    %182 = math.tanh %181 : vector<8x128xf32>
    %183 = arith.mulf %177, %182 : vector<8x128xf32>
    %c64_i32_50 = arith.constant 64 : i32
    %184 = tpu.dynamic_rotate %183 by %c64_i32_50 dim 1 : vector<8x128xf32>, i32 -> vector<8x128xf32>
    %185 = arith.select %10, %184, %181 : vector<8x128xi1>, vector<8x128xf32>
    %c6_i32 = arith.constant 6 : i32
    %186 = vector.extract_strided_slice %185 {offsets = [0, 0], sizes = [8, 64], strides = [1, 1]} : vector<8x128xf32> to vector<8x64xf32>
    %c8_i32_51 = arith.constant 8 : i32
    %187 = arith.muli %c6_i32, %c8_i32_51 : i32
    %188 = tpu.assume_multiple %187, 8 : i32
    %189 = arith.index_cast %188 : i32 to index
    %c0_52 = arith.constant 0 : index
    %190 = vector.load %arg6[%189, %c0_52] : memref<64x256xf32, #tpu.memory_space<vmem>>, vector<8x256xf32>
    %cst_53 = arith.constant dense<0.000000e+00> : vector<8x256xf32>
    %191 = tpu.matmul %186, %7, %cst_53 {dimension_numbers = #tpu.dot_dimension_numbers<[1], [0], [0], [1], [0, 0, 1, 1], [], []>} : vector<8x64xf32>, vector<64x256xf32>, vector<8x256xf32> -> vector<8x256xf32>
    %192 = arith.addf %190, %191 : vector<8x256xf32>
    %193 = vector.extract_strided_slice %192 {offsets = [0, 0], sizes = [8, 128], strides = [1, 1]} : vector<8x256xf32> to vector<8x128xf32>
    %194 = vector.extract_strided_slice %192 {offsets = [0, 128], sizes = [8, 128], strides = [1, 1]} : vector<8x256xf32> to vector<8x128xf32>
    %195 = arith.negf %193 : vector<8x128xf32>
    %196 = math.exp %195 : vector<8x128xf32>
    %cst_54 = arith.constant 1.000000e+00 : f32
    %197 = vector.broadcast %cst_54 : f32 to vector<8x128xf32>
    %198 = arith.addf %197, %196 : vector<8x128xf32>
    %199 = arith.divf %197, %198 : vector<8x128xf32>
    %200 = math.tanh %194 : vector<8x128xf32>
    %201 = arith.negf %194 : vector<8x128xf32>
    %202 = math.exp %201 : vector<8x128xf32>
    %cst_55 = arith.constant 1.000000e+00 : f32
    %203 = vector.broadcast %cst_55 : f32 to vector<8x128xf32>
    %204 = arith.addf %203, %202 : vector<8x128xf32>
    %205 = arith.divf %203, %204 : vector<8x128xf32>
    %206 = arith.select %10, %200, %205 : vector<8x128xi1>, vector<8x128xf32>
    %207 = arith.mulf %199, %206 : vector<8x128xf32>
    %208 = arith.mulf %199, %185 : vector<8x128xf32>
    %c64_i32_56 = arith.constant 64 : i32
    %209 = tpu.dynamic_rotate %207 by %c64_i32_56 dim 1 : vector<8x128xf32>, i32 -> vector<8x128xf32>
    %210 = arith.addf %208, %209 : vector<8x128xf32>
    %211 = math.tanh %210 : vector<8x128xf32>
    %212 = arith.mulf %206, %211 : vector<8x128xf32>
    %c64_i32_57 = arith.constant 64 : i32
    %213 = tpu.dynamic_rotate %212 by %c64_i32_57 dim 1 : vector<8x128xf32>, i32 -> vector<8x128xf32>
    %214 = arith.select %10, %213, %210 : vector<8x128xi1>, vector<8x128xf32>
    %c7_i32 = arith.constant 7 : i32
    %215 = vector.extract_strided_slice %214 {offsets = [0, 0], sizes = [8, 64], strides = [1, 1]} : vector<8x128xf32> to vector<8x64xf32>
    %c8_i32_58 = arith.constant 8 : i32
    %216 = arith.muli %c7_i32, %c8_i32_58 : i32
    %217 = tpu.assume_multiple %216, 8 : i32
    %218 = arith.index_cast %217 : i32 to index
    %c0_59 = arith.constant 0 : index
    %219 = vector.load %arg6[%218, %c0_59] : memref<64x256xf32, #tpu.memory_space<vmem>>, vector<8x256xf32>
    %cst_60 = arith.constant dense<0.000000e+00> : vector<8x256xf32>
    %220 = tpu.matmul %215, %7, %cst_60 {dimension_numbers = #tpu.dot_dimension_numbers<[1], [0], [0], [1], [0, 0, 1, 1], [], []>} : vector<8x64xf32>, vector<64x256xf32>, vector<8x256xf32> -> vector<8x256xf32>
    %221 = arith.addf %219, %220 : vector<8x256xf32>
    %222 = vector.extract_strided_slice %221 {offsets = [0, 0], sizes = [8, 128], strides = [1, 1]} : vector<8x256xf32> to vector<8x128xf32>
    %223 = vector.extract_strided_slice %221 {offsets = [0, 128], sizes = [8, 128], strides = [1, 1]} : vector<8x256xf32> to vector<8x128xf32>
    %224 = arith.negf %222 : vector<8x128xf32>
    %225 = math.exp %224 : vector<8x128xf32>
    %cst_61 = arith.constant 1.000000e+00 : f32
    %226 = vector.broadcast %cst_61 : f32 to vector<8x128xf32>
    %227 = arith.addf %226, %225 : vector<8x128xf32>
    %228 = arith.divf %226, %227 : vector<8x128xf32>
    %229 = math.tanh %223 : vector<8x128xf32>
    %230 = arith.negf %223 : vector<8x128xf32>
    %231 = math.exp %230 : vector<8x128xf32>
    %cst_62 = arith.constant 1.000000e+00 : f32
    %232 = vector.broadcast %cst_62 : f32 to vector<8x128xf32>
    %233 = arith.addf %232, %231 : vector<8x128xf32>
    %234 = arith.divf %232, %233 : vector<8x128xf32>
    %235 = arith.select %10, %229, %234 : vector<8x128xi1>, vector<8x128xf32>
    %236 = arith.mulf %228, %235 : vector<8x128xf32>
    %237 = arith.mulf %228, %214 : vector<8x128xf32>
    %c64_i32_63 = arith.constant 64 : i32
    %238 = tpu.dynamic_rotate %236 by %c64_i32_63 dim 1 : vector<8x128xf32>, i32 -> vector<8x128xf32>
    %239 = arith.addf %237, %238 : vector<8x128xf32>
    %240 = math.tanh %239 : vector<8x128xf32>
    %241 = arith.mulf %235, %240 : vector<8x128xf32>
    %c64_i32_64 = arith.constant 64 : i32
    %242 = tpu.dynamic_rotate %241 by %c64_i32_64 dim 1 : vector<8x128xf32>, i32 -> vector<8x128xf32>
    %243 = arith.select %10, %242, %239 : vector<8x128xi1>, vector<8x128xf32>
    %c8_i32_65 = arith.constant 8 : i32
    %244 = vector.extract_strided_slice %243 {offsets = [0, 0], sizes = [8, 64], strides = [1, 1]} : vector<8x128xf32> to vector<8x64xf32>
    %c0_66 = arith.constant 0 : index
    %c0_67 = arith.constant 0 : index
    %c0_68 = arith.constant 0 : index
    %245 = vector.load %arg5[%c0_66, %c0_67, %c0_68] : memref<1x8x64xf32, #tpu.memory_space<vmem>>, vector<1x8x64xf32>
    %246 = vector.shape_cast %245 : vector<1x8x64xf32> to vector<8x64xf32>
    %247 = vector.shape_cast %244 : vector<8x64xf32> to vector<1x8x64xf32>
    tpu.vector_store %arg5[%c0_66, %c0_67, %c0_68], %247 {strides = array<i32>} : memref<1x8x64xf32, #tpu.memory_space<vmem>>, vector<1x8x64xf32>,
    return
  }
  func.func @transform_0(%arg0: i32) -> (i32, i32) {
    %c0_i32 = arith.constant 0 : i32
    %c0_i32_0 = arith.constant 0 : i32
    %c0_i32_1 = arith.constant 0 : i32
    return %c0_i32, %c0_i32_0 : i32, i32
  }
  func.func @transform_1(%arg0: i32) -> (i32, i32) {
    %c0_i32 = arith.constant 0 : i32
    %c0_i32_0 = arith.constant 0 : i32
    %c0_i32_1 = arith.constant 0 : i32
    return %c0_i32, %c0_i32_0 : i32, i32
  }
  func.func @transform_2(%arg0: i32) -> (i32, i32) {
    %c0_i32 = arith.constant 0 : i32
    %c0_i32_0 = arith.constant 0 : i32
    %c0_i32_1 = arith.constant 0 : i32
    return %c0_i32, %c0_i32_0 : i32, i32
  }
  func.func @transform_3(%arg0: i32) -> (i32, i32) {
    %c0_i32 = arith.constant 0 : i32
    %c0_i32_0 = arith.constant 0 : i32
    %c0_i32_1 = arith.constant 0 : i32
    return %c0_i32, %c0_i32_0 : i32, i32
  }
  func.func @transform_4(%arg0: i32) -> (i32, i32, i32) {
    %c0_i32 = arith.constant 0 : i32
    %c0_i32_0 = arith.constant 0 : i32
    %c0_i32_1 = arith.constant 0 : i32
    %c0_i32_2 = arith.constant 0 : i32
    return %c0_i32, %c0_i32_0, %c0_i32_1 : i32, i32, i32
  }
}

</mosaic_0001>

<bundles_post_ra>
// kernel: tpu_custom_call.1
= control target key start
LH: loop header
LB: loop body
LE: loop exit
PB: predicated region body
PF: predicated region fallthrough
CT: control target
= control target key end

     0   :  { %9 = vsyncpa [#allocation4], 0  ;;  %s1639_s0 = inlined_call_operand.vmem [shape: f32[64,2], index: 0, kind: input, shape index: {}]   ;;  %s1640_s1 = inlined_call_operand.vmem [shape: f32[2,256], index: 1, kind: input, shape index: {}]   ;;  %s1641_s2 = inlined_call_operand.hbm [shape: f32[64,256], index: 2, kind: input, shape index: {}]   ;;  %s1642_s3 = inlined_call_operand.vmem [shape: f32[1,256], index: 3, kind: input, shape index: {}]   ;;  %s1643_s4 = inlined_call_operand.hbm [shape: f32[1,8,64], index: 4, kind: output, shape index: {}]  }
   0x1   :  { %10 = vsyncpa [#allocation5], 0  ;;  %s1284_s15 = smov [#allocation3]  }
   0x2   :  { %s20_s16 = sshll.u32 %s1284_s15, 4  ;;  %s21_s16 = int_to_ptr.vmem [resolvable:$true] %s20_s16 }
   0x3   :  { %s1248_s17 = scalar_lea.vmem %s21_s16, 2048  ;;  %p1253_p1 = scmp.lt.s32.totalorder %s21_s16, %s21_s16 }
   0x4   :  { %p1249_p0 = scmp.ne.s32.totalorder %s21_s16, %s1248_s17  ;;  %p1254_p2 = scmp.lt.s32.totalorder %s1248_s17, %s1248_s17 }
   0x6   :  { %p1255_p3 = por %p1254_p2, %p1253_p1 }
   0x8   :  { %p1256_p4 = pnand %p1255_p3, %p1249_p0 }
   0xa   :  { %1259 = shalt.err (!%p1256_p4)
}
   0xb   :  { %s1285_s18 = smov 256   ;;  %s1286_s19 = smov 16  }
   0xc   :  { %26 = dma.hbm_to_vmem [thread:$0]  %s1641_s2, 2048, %s21_s16, [#allocation4], %s1285_s18, %s1285_s18, %s1286_s19  }
   0xd   :  { %1280 = dma.done.wait [#allocation4], 2048  }
   0xe   :  { %1281 = vsyncadd [#allocation4], 4294965248  ;;  %v1287_v0 = vmov 0.0   ;;  %v1320_v1 = vld [vmem:[#allocation3 + $0x78] sm:$0xff]  ;;  %v1322_v2 = vld [vmem:[#allocation3 + $0x70] sm:$0xff]  ;;  %vm87_vm0 = vcmask 1041408   ;;  %v43_v20 = vlaneseq }
   0xf   :  { %156 = vmatprep.mubr.f32.mxu0 %v1287_v0  ;;  %313 = vmatprep.mubr.f32.mxu1 %v1287_v0  ;;  %v1324_v3 = vld [vmem:[#allocation3 + $0x68] sm:$0xff]  ;;  %v1327_v4 = vld [vmem:[#allocation3 + $0x60] sm:$0xff]  ;;  %v1330_v5 = vld [vmem:[#allocation3 + $0x58] sm:$0xff]  ;;  %vm62_vm1 = vcmask 15360   ;;  %vm245_vm3 = vcmask 523264  }
  0x10   :  { %265 = vmatprep.subr.mxu1 %v1320_v1  ;;  %v1333_v6 = vld [vmem:[#allocation3 + $0x50] sm:$0xff]  ;;  %v1104_v7 = vld.sshfl [vmem:[%s1640_s1] sm:$0x33 pattern:$0x76325410]  ;;  %v1339_v8 = vld [vmem:[#allocation3 + $0x48] sm:$0xff] }
  0x11   :  { %266 = vmatpush1.msra.mxu1 %v1322_v2  ;;  %v61_v9 = vcombine.high %v1104_v7, %v1104_v7  ;;  %v1342_v10 = vld [vmem:[#allocation3 + $0x40] sm:$0xff]  ;;  %v1348_v12 = vld [vmem:[#allocation3 + $0x38] sm:$0xff]  ;;  %v1351_v13 = vld [vmem:[#allocation3 + $0x30] sm:$0xff]  ;;  %v44_v21 = vshrl.u32 %v43_v20, 7  ;;  %v1421_v41 = vand.u32 127, %v43_v20 }
  0x12   :  { %267 = vmatprep.subr.mxu1 %v1324_v3  ;;  %v32_v11 = vld [vmem:[%s1639_s0] sm:$0xff]  ;;  %v1354_v14 = vld [vmem:[#allocation3 + $0x28] sm:$0xff]  ;;  %v1362_v16 = vld [vmem:[#allocation3 + $0x18] sm:$0xff] }
  0x13   :  { %268 = vmatpush1.msra.mxu1 %v1327_v4  ;;  %1105 = vmatprep.subr.msk.mxu0 %vm87_vm0, %v61_v9  ;;  %v1358_v15 = vld [vmem:[#allocation3 + $0x20] sm:$0xff]  ;;  %v1366_v17 = vld [vmem:[#allocation3 + $0x10] sm:$0xff]  ;;  %v1370_v18 = vld [vmem:[#allocation3 + $0x8] sm:$0xff]  ;;  %v45_v22 = vsub.s32 0, %v44_v21  ;;  %v49_v25 = vsub.s32 1, %v44_v21  ;;  %vm239_vm2 = vcmp.lt.s32.totalorder %v1421_v41, 64 }
  0x14   :  { %269 = vmatprep.subr.mxu1 %v1330_v5  ;;  %1106 = vmatpush1.msk.msra.mxu0 %vm87_vm0, %v1104_v7  ;;  %v1374_v19 = vld [vmem:[#allocation3] sm:$0xff]  ;;  %v33_v47 = vld [vmem:[%s1639_s0 + $0x8] sm:$0xff] }
  0x15   :  { %270 = vmatpush1.msra.mxu1 %v1333_v6  ;;  %1107 = vmatmul.mubr.msk.f32.vlgmr.msra.gmra.mxu0 %vm62_vm1, %v32_v11  ;;  %v41_v23 = vld [vmem:[%s1642_s3] sm:$0x3]  ;;  %s1288_s3 = smov 64  }
  0x16   :  { %271 = vmatprep.subr.mxu1 %v1339_v8  ;;  %162 = vmatprep.mubr.f32.mxu0 %v1287_v0  ;;  %v1415_v24 = vrot.slane %v41_v23, %v45_v22  ;;  %v1418_v28 = vrot.slane %v41_v23, %v49_v25 }
  0x17   :  { %272 = vmatpush1.msra.mxu1 %v1342_v10  ;;  %475 = vmatprep.subr.mxu0 %v1320_v1 }
  0x18   :  { %273 = vmatprep.subr.mxu1 %v1348_v12  ;;  %476 = vmatpush1.msra.mxu0 %v1322_v2 }
  0x19   :  { %274 = vmatpush1.msra.mxu1 %v1351_v13  ;;  %477 = vmatprep.subr.mxu0 %v1324_v3 }
  0x1a   :  { %275 = vmatprep.subr.mxu1 %v1354_v14  ;;  %478 = vmatpush1.msra.mxu0 %v1327_v4 }
  0x1b   :  { %276 = vmatpush1.msra.mxu1 %v1358_v15  ;;  %479 = vmatprep.subr.mxu0 %v1330_v5 }
  0x1c   :  { %277 = vmatprep.subr.mxu1 %v1362_v16  ;;  %480 = vmatpush1.msra.mxu0 %v1333_v6 }
  0x1d   :  { %278 = vmatpush1.msra.mxu1 %v1366_v17  ;;  %481 = vmatprep.subr.mxu0 %v1339_v8 }
  0x1e   :  { %279 = vmatprep.subr.mxu1 %v1370_v18  ;;  %482 = vmatpush1.msra.mxu0 %v1342_v10 }
  0x1f   :  { %280 = vmatpush1.msra.mxu1 %v1374_v19  ;;  %483 = vmatprep.subr.mxu0 %v1348_v12 }
  0x20   :  { %314 = vmatmul.mubr.f32.vlgmr.msra.gmra.mxu1 %v1287_v0  ;;  %370 = vmatprep.subr.mxu1 %v1320_v1 }
  0x21   :  { %371 = vmatpush1.msra.mxu1 %v1322_v2  ;;  %418 = vmatprep.mubr.f32.mxu1 %v1287_v0 }
  0x22   :  { %372 = vmatprep.subr.mxu1 %v1324_v3  ;;  %484 = vmatpush1.msra.mxu0 %v1351_v13 }
  0x23   :  { %373 = vmatpush1.msra.mxu1 %v1327_v4  ;;  %485 = vmatprep.subr.mxu0 %v1354_v14 }
  0x24   :  { %374 = vmatprep.subr.mxu1 %v1330_v5  ;;  %486 = vmatpush1.msra.mxu0 %v1358_v15 }
  0x25   :  { %375 = vmatpush1.msra.mxu1 %v1333_v6  ;;  %487 = vmatprep.subr.mxu0 %v1362_v16 }
  0x26   :  { %376 = vmatprep.subr.mxu1 %v1339_v8  ;;  %488 = vmatpush1.msra.mxu0 %v1366_v17 }
  0x27   :  { %377 = vmatpush1.msra.mxu1 %v1342_v10  ;;  %489 = vmatprep.subr.mxu0 %v1370_v18 }
  0x28   :  { %378 = vmatprep.subr.mxu1 %v1348_v12  ;;  %490 = vmatpush1.msra.mxu0 %v1374_v19 }
  0x29   :  { %379 = vmatpush1.msra.mxu1 %v1351_v13  ;;  %685 = vmatprep.subr.mxu0 %v1320_v1 }
  0x2a   :  { %380 = vmatprep.subr.mxu1 %v1354_v14  ;;  %1108 = vmatmul.mubr.msk.f32.gmra.mxu0 %vm62_vm1, %v33_v47 }
  0x2b   :  { %381 = vmatpush1.msra.mxu1 %v1358_v15  ;;  %168 = vmatprep.mubr.f32.mxu0 %v1287_v0 }
  0x2c   :  { %382 = vmatprep.subr.mxu1 %v1362_v16 }
  0x2d   :  { %383 = vmatpush1.msra.mxu1 %v1366_v17 }
  0x2e   :  { %384 = vmatprep.subr.mxu1 %v1370_v18 }
  0x2f   :  { %385 = vmatpush1.msra.mxu1 %v1374_v19 }
  0x30   :  { %580 = vmatprep.subr.mxu1 %v1320_v1 }
  0xd5   :  { %v158_v26 = vpop.f32.mrf.mxu0 }
  0xd6   :  { %v159_v27 = vadd.f32 %v158_v26, %v1415_v24 }
  0xd7   :  { %v160_v29 = vpop.f32.mrf.mxu0 }
  0xd8   :  { %v161_v31 = vadd.f32 %v160_v29, %v1418_v28  ;;  %v34_v29 = vld [vmem:[%s1639_s0 + $0x10] sm:$0xff] }
  0xd9   :  { %1109 = vmatmul.mubr.msk.f32.gmra.mxu0 %vm62_vm1, %v34_v29 }
  0xda   :  { %174 = vmatprep.mubr.f32.mxu0 %v1287_v0 }
  0xe0   :  { %v315_v30 = vpop.f32.mrf.mxu1 }
  0xe1   :  { %v320_v32 = vadd.f32 %v315_v30, %v159_v27  ;;  %v35_v30 = vld [vmem:[%s1639_s0 + $0x18] sm:$0xff] }
  0xe2   :  { %v317_v33 = vpop.f32.mrf.mxu1  ;;  %1110 = vmatmul.mubr.msk.f32.gmra.mxu0 %vm62_vm1, %v35_v30 }
  0xe3   :  { %v1115_v34 = vmul.f32 -1.442695, %v320_v32  ;;  %v321_v35 = vadd.f32 %v317_v33, %v161_v31  ;;  %180 = vmatprep.mubr.f32.mxu0 %v1287_v0  ;;  %v36_v31 = vld [vmem:[%s1639_s0 + $0x20] sm:$0xff]  ;;  %v37_v32 = vld [vmem:[%s1639_s0 + $0x28] sm:$0xff]  ;;  %v38_v33 = vld [vmem:[%s1639_s0 + $0x30] sm:$0xff] }
  0xe5   :  { %1144 = vpow2.f32 %v1115_v34  ;;  %v1116_v36 = vmul.f32 -1.442695, %v321_v35  ;;  %v39_v34 = vld [vmem:[%s1639_s0 + $0x38] sm:$0xff]  ;;  %s1289_s0 = smov [#allocation6]  }
  0xe6   :  { %1111 = vmatmul.mubr.msk.f32.gmra.mxu0 %vm62_vm1, %v36_v31  ;;  %s1088_s14 = sshll.u32 %s1289_s0, 4  ;;  %s1089_s14 = int_to_ptr.vmem [resolvable:$true] %s1088_s14 }
  0xe7   :  { %1146 = vpow2.f32 %v1116_v36  ;;  %186 = vmatprep.mubr.f32.mxu0 %v1287_v0  ;;  %s1260_s15 = scalar_lea.vmem %s1089_s14, 128  ;;  %p1265_p6 = scmp.lt.s32.totalorder %s1089_s14, %s1089_s14 }
  0xe8   :  { %1148 = vtanh.f32 %v321_v35  ;;  %p1261_p5 = scmp.ne.s32.totalorder %s1089_s14, %s1260_s15  ;;  %p1266_p7 = scmp.lt.s32.totalorder %s1260_s15, %s1260_s15 }
  0xea   :  { %v164_v55 = vpop.f32.mrf.mxu0  ;;  %1112 = vmatmul.mubr.msk.f32.gmra.mxu0 %vm62_vm1, %v37_v32  ;;  %p1267_p8 = por %p1266_p7, %p1265_p6 }
  0xeb   :  { %v165_v56 = vadd.f32 %v164_v55, %v1415_v24  ;;  %192 = vmatprep.mubr.f32.mxu0 %v1287_v0 }
  0xec   :  { %v166_v57 = vpop.f32.mrf.mxu0  ;;  %p1268_p9 = pnand %p1267_p8, %p1261_p5 }
  0xed   :  { %v167_v59 = vadd.f32 %v166_v57, %v1418_v28 }
  0xee   :  { %1113 = vmatmul.mubr.msk.f32.gmra.mxu0 %vm62_vm1, %v38_v33 }
  0xef   :  { %198 = vmatprep.mubr.f32.mxu0 %v1287_v0 }
  0xf2   :  { %v1145_v37 = vpop.eup %1144  ;;  %1114 = vmatmul.mubr.msk.f32.gmra.mxu0 %vm62_vm1, %v39_v34 }
  0xf3   :  { %v325_v39 = vadd.f32 1.0, %v1145_v37  ;;  %523 = vmatprep.mubr.f32.mxu0 %v1287_v0 }
  0xf4   :  { %v1147_v38 = vpop.eup %1146 }
  0xf5   :  { %v332_v40 = vadd.f32 1.0, %v1147_v38  ;;  %v1149_v42 = vpop.eup %1148 }
  0xf7   :  { %1150 = vrcp.f32 %v332_v40 }
  0xf8   :  { %1152 = vrcp.f32 %v325_v39 }
 0x104   :  { %v1151_v43 = vpop.eup %1150 }
 0x105   :  { %v1153_v44 = vpop.eup %1152  ;;  %v335_v45 = vsel %vm239_vm2, %v1149_v42, %v1151_v43 }
 0x106   :  { %v336_v46 = vmul.f32 %v1153_v44, %v335_v45  ;;  %v337_v48 = vmul.f32 0.0, %v1153_v44 }
 0x108   :  { %338 = vrot.lane.b32.xlu0 %v336_v46, %s1288_s3 }
 0x17a   :  { %v339_v49 = vpop.permute.xlu0 %338 }
 0x17b   :  { %v340_v50 = vadd.f32 %v339_v49, %v337_v48 }
 0x17d   :  { %1154 = vtanh.f32 %v340_v50 }
 0x18a   :  { %v1155_v51 = vpop.eup %1154 }
 0x18b   :  { %v342_v52 = vmul.f32 %v1155_v51, %v335_v45 }
 0x18d   :  { %343 = vrot.lane.b32.xlu0 %v342_v52, %s1288_s3 }
 0x199   :  { %v170_v43 = vpop.f32.mrf.mxu0 }
 0x19a   :  { %v171_v55 = vadd.f32 %v170_v43, %v1415_v24 }
 0x19b   :  { %v172_v44 = vpop.f32.mrf.mxu0 }
 0x19c   :  { %v173_v57 = vadd.f32 %v172_v44, %v1418_v28 }
 0x1a2   :  { %v176_v45 = vpop.f32.mrf.mxu0 }
 0x1a3   :  { %v177_v34 = vadd.f32 %v176_v45, %v1415_v24 }
 0x1a4   :  { %v178_v46 = vpop.f32.mrf.mxu0 }
 0x1a6   :  { %v1509_v47 = vpop.f32.mrf.mxu0 }
 0x1a8   :  { %v1511_v48 = vpop.f32.mrf.mxu0 }
 0x1aa   :  { %v1513_v49 = vpop.f32.mrf.mxu0 }
 0x1ff   :  { %v344_v53 = vpop.permute.xlu0 %343 }
 0x200   :  { %v345_v54 = vsel %vm239_vm2, %v344_v53, %v340_v50  ;;  %v1515_v50 = vpop.f32.mrf.mxu0 }
 0x201   :  { %1117 = vmatmul.mubr.msk.f32.vlgmr.msra.gmra.mxu1 %vm245_vm3, %v345_v54 }
 0x202   :  { %581 = vmatpush1.msra.mxu1 %v1322_v2  ;;  %628 = vmatprep.mubr.f32.mxu1 %v1287_v0  ;;  %v1517_v51 = vpop.f32.mrf.mxu0 }
 0x203   :  { %582 = vmatprep.subr.mxu1 %v1324_v3 }
 0x204   :  { %583 = vmatpush1.msra.mxu1 %v1327_v4  ;;  %v1519_v52 = vpop.f32.mrf.mxu0 }
 0x205   :  { %584 = vmatprep.subr.mxu1 %v1330_v5 }
 0x206   :  { %585 = vmatpush1.msra.mxu1 %v1333_v6  ;;  %v1521_v53 = vpop.f32.mrf.mxu0 }
 0x207   :  { %586 = vmatprep.subr.mxu1 %v1339_v8 }
 0x208   :  { %587 = vmatpush1.msra.mxu1 %v1342_v10 }
 0x209   :  { %588 = vmatprep.subr.mxu1 %v1348_v12 }
 0x20a   :  { %589 = vmatpush1.msra.mxu1 %v1351_v13 }
 0x20b   :  { %590 = vmatprep.subr.mxu1 %v1354_v14 }
 0x20c   :  { %591 = vmatpush1.msra.mxu1 %v1358_v15 }
 0x20d   :  { %592 = vmatprep.subr.mxu1 %v1362_v16 }
 0x20e   :  { %593 = vmatpush1.msra.mxu1 %v1366_v17 }
 0x20f   :  { %594 = vmatprep.subr.mxu1 %v1370_v18 }
 0x210   :  { %595 = vmatpush1.msra.mxu1 %v1374_v19 }
 0x211   :  { %790 = vmatprep.subr.mxu1 %v1320_v1 }
 0x2c1   :  { %v420_v58 = vpop.f32.mrf.mxu1 }
 0x2c2   :  { %v425_v60 = vadd.f32 %v420_v58, %v165_v56 }
 0x2c3   :  { %v422_v61 = vpop.f32.mrf.mxu1 }
 0x2c4   :  { %v1118_v62 = vmul.f32 -1.442695, %v425_v60  ;;  %v426_v63 = vadd.f32 %v422_v61, %v167_v59 }
 0x2c6   :  { %1156 = vpow2.f32 %v1118_v62  ;;  %v1119_v7 = vmul.f32 -1.442695, %v426_v63 }
 0x2c8   :  { %1158 = vpow2.f32 %v1119_v7 }
 0x2c9   :  { %1160 = vtanh.f32 %v426_v63 }
 0x2d3   :  { %v1157_v9 = vpop.eup %1156 }
 0x2d4   :  { %v430_v20 = vadd.f32 1.0, %v1157_v9 }
 0x2d5   :  { %v1159_v11 = vpop.eup %1158 }
 0x2d6   :  { %v437_v21 = vadd.f32 1.0, %v1159_v11  ;;  %v1161_v22 = vpop.eup %1160 }
 0x2d8   :  { %1162 = vrcp.f32 %v437_v21 }
 0x2d9   :  { %1164 = vrcp.f32 %v430_v20 }
 0x2e5   :  { %v1163_v23 = vpop.eup %1162 }
 0x2e6   :  { %v1165_v25 = vpop.eup %1164  ;;  %v440_v26 = vsel %vm239_vm2, %v1161_v22, %v1163_v23 }
 0x2e7   :  { %v441_v27 = vmul.f32 %v1165_v25, %v440_v26  ;;  %v442_v35 = vmul.f32 %v1165_v25, %v345_v54  ;;  %v1523_v54 = vpop.f32.mrf.mxu0 }
 0x2e9   :  { %443 = vrot.lane.b32.xlu1 %v441_v27, %s1288_s3 }
 0x35b   :  { %v444_v36 = vpop.permute.xlu1 %443 }
 0x35c   :  { %v445_v37 = vadd.f32 %v444_v36, %v442_v35  ;;  %v179_v36 = vadd.f32 %v178_v46, %v1418_v28 }
 0x35e   :  { %1166 = vtanh.f32 %v445_v37 }
 0x36b   :  { %v1167_v38 = vpop.eup %1166 }
 0x36c   :  { %v447_v39 = vmul.f32 %v1167_v38, %v440_v26 }
 0x36e   :  { %448 = vrot.lane.b32.xlu1 %v447_v39, %s1288_s3 }
 0x3e0   :  { %v449_v40 = vpop.permute.xlu1 %448 }
 0x3e1   :  { %v450_v42 = vsel %vm239_vm2, %v449_v40, %v445_v37 }
 0x3e2   :  { %1120 = vmatmul.mubr.msk.f32.vlgmr.msra.gmra.mxu0 %vm245_vm3, %v450_v42 }
 0x3e3   :  { %686 = vmatpush1.msra.mxu0 %v1322_v2  ;;  %733 = vmatprep.mubr.f32.mxu0 %v1287_v0 }
 0x3e4   :  { %687 = vmatprep.subr.mxu0 %v1324_v3 }
 0x3e5   :  { %688 = vmatpush1.msra.mxu0 %v1327_v4 }
 0x3e6   :  { %689 = vmatprep.subr.mxu0 %v1330_v5 }
 0x3e7   :  { %690 = vmatpush1.msra.mxu0 %v1333_v6 }
 0x3e8   :  { %691 = vmatprep.subr.mxu0 %v1339_v8 }
 0x3e9   :  { %692 = vmatpush1.msra.mxu0 %v1342_v10 }
 0x3ea   :  { %693 = vmatprep.subr.mxu0 %v1348_v12 }
 0x3eb   :  { %694 = vmatpush1.msra.mxu0 %v1351_v13 }
 0x3ec   :  { %695 = vmatprep.subr.mxu0 %v1354_v14 }
 0x3ed   :  { %696 = vmatpush1.msra.mxu0 %v1358_v15 }
 0x3ee   :  { %697 = vmatprep.subr.mxu0 %v1362_v16 }
 0x3ef   :  { %698 = vmatpush1.msra.mxu0 %v1366_v17 }
 0x3f0   :  { %699 = vmatprep.subr.mxu0 %v1370_v18 }
 0x3f1   :  { %700 = vmatpush1.msra.mxu0 %v1374_v19 }
 0x3f2   :  { %895 = vmatprep.subr.mxu0 %v1320_v1 }
 0x4a2   :  { %v525_v56 = vpop.f32.mrf.mxu0 }
 0x4a3   :  { %v530_v58 = vadd.f32 %v525_v56, %v171_v55 }
 0x4a4   :  { %v527_v59 = vpop.f32.mrf.mxu0 }
 0x4a5   :  { %v1121_v60 = vmul.f32 -1.442695, %v530_v58  ;;  %v531_v61 = vadd.f32 %v527_v59, %v173_v57 }
 0x4a7   :  { %1168 = vpow2.f32 %v1121_v60  ;;  %v1122_v62 = vmul.f32 -1.442695, %v531_v61 }
 0x4a9   :  { %1170 = vpow2.f32 %v1122_v62 }
 0x4aa   :  { %1172 = vtanh.f32 %v531_v61 }
 0x4b4   :  { %v1169_v63 = vpop.eup %1168 }
 0x4b5   :  { %v535_v9 = vadd.f32 1.0, %v1169_v63 }
 0x4b6   :  { %v1171_v7 = vpop.eup %1170 }
 0x4b7   :  { %v542_v11 = vadd.f32 1.0, %v1171_v7  ;;  %v1173_v20 = vpop.eup %1172 }
 0x4b9   :  { %1174 = vrcp.f32 %v542_v11  ;;  %v183_v11 = vadd.f32 %v1509_v47, %v1415_v24 }
 0x4ba   :  { %1176 = vrcp.f32 %v535_v9 }
 0x4c6   :  { %v1175_v21 = vpop.eup %1174 }
 0x4c7   :  { %v1177_v22 = vpop.eup %1176  ;;  %v545_v23 = vsel %vm239_vm2, %v1173_v20, %v1175_v21  ;;  %v185_v21 = vadd.f32 %v1511_v48, %v1418_v28 }
 0x4c8   :  { %v546_v25 = vmul.f32 %v1177_v22, %v545_v23  ;;  %v547_v26 = vmul.f32 %v1177_v22, %v450_v42 }
 0x4ca   :  { %548 = vrot.lane.b32.xlu0 %v546_v25, %s1288_s3 }
 0x53c   :  { %v549_v27 = vpop.permute.xlu0 %548 }
 0x53d   :  { %v550_v29 = vadd.f32 %v549_v27, %v547_v26 }
 0x53f   :  { %1178 = vtanh.f32 %v550_v29 }
 0x54c   :  { %v1179_v30 = vpop.eup %1178 }
 0x54d   :  { %v552_v31 = vmul.f32 %v1179_v30, %v545_v23 }
 0x54f   :  { %553 = vrot.lane.b32.xlu1 %v552_v31, %s1288_s3 }
 0x5c1   :  { %v554_v32 = vpop.permute.xlu1 %553 }
 0x5c2   :  { %v555_v33 = vsel %vm239_vm2, %v554_v32, %v550_v29 }
 0x5c3   :  { %1123 = vmatmul.mubr.msk.f32.vlgmr.msra.gmra.mxu1 %vm245_vm3, %v555_v33 }
 0x5c4   :  { %791 = vmatpush1.msra.mxu1 %v1322_v2  ;;  %838 = vmatprep.mubr.f32.mxu1 %v1287_v0 }
 0x5c5   :  { %792 = vmatprep.subr.mxu1 %v1324_v3 }
 0x5c6   :  { %793 = vmatpush1.msra.mxu1 %v1327_v4 }
 0x5c7   :  { %794 = vmatprep.subr.mxu1 %v1330_v5 }
 0x5c8   :  { %795 = vmatpush1.msra.mxu1 %v1333_v6 }
 0x5c9   :  { %796 = vmatprep.subr.mxu1 %v1339_v8 }
 0x5ca   :  { %797 = vmatpush1.msra.mxu1 %v1342_v10 }
 0x5cb   :  { %798 = vmatprep.subr.mxu1 %v1348_v12 }
 0x5cc   :  { %799 = vmatpush1.msra.mxu1 %v1351_v13 }
 0x5cd   :  { %800 = vmatprep.subr.mxu1 %v1354_v14 }
 0x5ce   :  { %801 = vmatpush1.msra.mxu1 %v1358_v15 }
 0x5cf   :  { %802 = vmatprep.subr.mxu1 %v1362_v16 }
 0x5d0   :  { %803 = vmatpush1.msra.mxu1 %v1366_v17 }
 0x5d1   :  { %804 = vmatprep.subr.mxu1 %v1370_v18 }
 0x5d2   :  { %805 = vmatpush1.msra.mxu1 %v1374_v19 }
 0x5d3   :  { %1000 = vmatprep.subr.mxu1 %v1320_v1 }
 0x683   :  { %v630_v35 = vpop.f32.mrf.mxu1 }
 0x684   :  { %v635_v37 = vadd.f32 %v630_v35, %v177_v34 }
 0x685   :  { %v632_v38 = vpop.f32.mrf.mxu1 }
 0x686   :  { %v1124_v39 = vmul.f32 -1.442695, %v635_v37  ;;  %v636_v40 = vadd.f32 %v632_v38, %v179_v36 }
 0x688   :  { %1180 = vpow2.f32 %v1124_v39  ;;  %v1125_v42 = vmul.f32 -1.442695, %v636_v40 }
 0x68a   :  { %1182 = vpow2.f32 %v1125_v42 }
 0x68b   :  { %1184 = vtanh.f32 %v636_v40 }
 0x695   :  { %v1181_v43 = vpop.eup %1180 }
 0x696   :  { %v640_v55 = vadd.f32 1.0, %v1181_v43 }
 0x697   :  { %v1183_v44 = vpop.eup %1182 }
 0x698   :  { %v647_v56 = vadd.f32 1.0, %v1183_v44  ;;  %v1185_v1 = vpop.eup %1184 }
 0x69a   :  { %1186 = vrcp.f32 %v647_v56 }
 0x69b   :  { %1188 = vrcp.f32 %v640_v55 }
 0x6a7   :  { %v1187_v57 = vpop.eup %1186 }
 0x6a8   :  { %v1189_v45 = vpop.eup %1188  ;;  %v650_v46 = vsel %vm239_vm2, %v1185_v1, %v1187_v57 }
 0x6a9   :  { %v651_v58 = vmul.f32 %v1189_v45, %v650_v46  ;;  %v652_v59 = vmul.f32 %v1189_v45, %v555_v33 }
 0x6ab   :  { %653 = vrot.lane.b32.xlu0 %v651_v58, %s1288_s3 }
 0x71d   :  { %v654_v60 = vpop.permute.xlu0 %653 }
 0x71e   :  { %v655_v61 = vadd.f32 %v654_v60, %v652_v59  ;;  %v197_v59 = vadd.f32 %v1519_v52, %v1418_v28 }
 0x720   :  { %1190 = vtanh.f32 %v655_v61 }
 0x72d   :  { %v1191_v62 = vpop.eup %1190 }
 0x72e   :  { %v657_v63 = vmul.f32 %v1191_v62, %v650_v46  ;;  %v195_v46 = vadd.f32 %v1517_v51, %v1415_v24 }
 0x730   :  { %658 = vrot.lane.b32.xlu1 %v657_v63, %s1288_s3 }
 0x7a2   :  { %v659_v7 = vpop.permute.xlu1 %658 }
 0x7a3   :  { %v660_v9 = vsel %vm239_vm2, %v659_v7, %v655_v61 }
 0x7a4   :  { %1126 = vmatmul.mubr.msk.f32.vlgmr.msra.gmra.mxu0 %vm245_vm3, %v660_v9 }
 0x7a5   :  { %896 = vmatpush1.msra.mxu0 %v1322_v2  ;;  %943 = vmatprep.mubr.f32.mxu0 %v1287_v0 }
 0x7a6   :  { %897 = vmatprep.subr.mxu0 %v1324_v3 }
 0x7a7   :  { %898 = vmatpush1.msra.mxu0 %v1327_v4 }
 0x7a8   :  { %899 = vmatprep.subr.mxu0 %v1330_v5 }
 0x7a9   :  { %900 = vmatpush1.msra.mxu0 %v1333_v6 }
 0x7aa   :  { %901 = vmatprep.subr.mxu0 %v1339_v8 }
 0x7ab   :  { %902 = vmatpush1.msra.mxu0 %v1342_v10 }
 0x7ac   :  { %903 = vmatprep.subr.mxu0 %v1348_v12 }
 0x7ad   :  { %904 = vmatpush1.msra.mxu0 %v1351_v13 }
 0x7ae   :  { %905 = vmatprep.subr.mxu0 %v1354_v14 }
 0x7af   :  { %906 = vmatpush1.msra.mxu0 %v1358_v15 }
 0x7b0   :  { %907 = vmatprep.subr.mxu0 %v1362_v16 }
 0x7b1   :  { %908 = vmatpush1.msra.mxu0 %v1366_v17 }
 0x7b2   :  { %909 = vmatprep.subr.mxu0 %v1370_v18 }
 0x7b3   :  { %910 = vmatpush1.msra.mxu0 %v1374_v19 }
 0x864   :  { %v735_v20 = vpop.f32.mrf.mxu0 }
 0x865   :  { %v740_v22 = vadd.f32 %v735_v20, %v183_v11 }
 0x866   :  { %v737_v23 = vpop.f32.mrf.mxu0 }
 0x867   :  { %v1127_v25 = vmul.f32 -1.442695, %v740_v22  ;;  %v741_v26 = vadd.f32 %v737_v23, %v185_v21 }
 0x869   :  { %1192 = vpow2.f32 %v1127_v25  ;;  %v1128_v27 = vmul.f32 -1.442695, %v741_v26 }
 0x86b   :  { %1194 = vpow2.f32 %v1128_v27 }
 0x86c   :  { %1196 = vtanh.f32 %v741_v26 }
 0x876   :  { %v1193_v29 = vpop.eup %1192 }
 0x877   :  { %v745_v31 = vadd.f32 1.0, %v1193_v29 }
 0x878   :  { %v1195_v30 = vpop.eup %1194 }
 0x879   :  { %v752_v32 = vadd.f32 1.0, %v1195_v30  ;;  %v1197_v33 = vpop.eup %1196 }
 0x87b   :  { %1198 = vrcp.f32 %v752_v32 }
 0x87c   :  { %1200 = vrcp.f32 %v745_v31 }
 0x888   :  { %v1199_v47 = vpop.eup %1198 }
 0x889   :  { %v1201_v34 = vpop.eup %1200  ;;  %v755_v48 = vsel %vm239_vm2, %v1197_v33, %v1199_v47  ;;  %v201_v47 = vadd.f32 %v1521_v53, %v1415_v24 }
 0x88a   :  { %v756_v35 = vmul.f32 %v1201_v34, %v755_v48  ;;  %v757_v36 = vmul.f32 %v1201_v34, %v660_v9 }
 0x88c   :  { %758 = vrot.lane.b32.xlu0 %v756_v35, %s1288_s3 }
 0x8fe   :  { %v759_v37 = vpop.permute.xlu0 %758 }
 0x8ff   :  { %v760_v38 = vadd.f32 %v759_v37, %v757_v36 }
 0x901   :  { %1202 = vtanh.f32 %v760_v38 }
 0x90e   :  { %v1203_v39 = vpop.eup %1202 }
 0x90f   :  { %v762_v40 = vmul.f32 %v1203_v39, %v755_v48  ;;  %v203_v48 = vadd.f32 %v1523_v54, %v1418_v28 }
 0x911   :  { %763 = vrot.lane.b32.xlu1 %v762_v40, %s1288_s3 }
 0x983   :  { %v764_v42 = vpop.permute.xlu1 %763 }
 0x984   :  { %v765_v43 = vsel %vm239_vm2, %v764_v42, %v760_v38 }
 0x985   :  { %1129 = vmatmul.mubr.msk.f32.vlgmr.msra.gmra.mxu1 %vm245_vm3, %v765_v43 }
 0x986   :  { %1001 = vmatpush1.msra.mxu1 %v1322_v2  ;;  %1048 = vmatprep.mubr.f32.mxu1 %v1287_v0  ;;  %v189_v0 = vadd.f32 %v1513_v49, %v1415_v24 }
 0x987   :  { %1002 = vmatprep.subr.mxu1 %v1324_v3  ;;  %v191_v3 = vadd.f32 %v1515_v50, %v1418_v28 }
 0x988   :  { %1003 = vmatpush1.msra.mxu1 %v1327_v4 }
 0x989   :  { %1004 = vmatprep.subr.mxu1 %v1330_v5 }
 0x98a   :  { %1005 = vmatpush1.msra.mxu1 %v1333_v6 }
 0x98b   :  { %1006 = vmatprep.subr.mxu1 %v1339_v8 }
 0x98c   :  { %1007 = vmatpush1.msra.mxu1 %v1342_v10 }
 0x98d   :  { %1008 = vmatprep.subr.mxu1 %v1348_v12 }
 0x98e   :  { %1009 = vmatpush1.msra.mxu1 %v1351_v13 }
 0x98f   :  { %1010 = vmatprep.subr.mxu1 %v1354_v14 }
 0x990   :  { %1011 = vmatpush1.msra.mxu1 %v1358_v15 }
 0x991   :  { %1012 = vmatprep.subr.mxu1 %v1362_v16 }
 0x992   :  { %1013 = vmatpush1.msra.mxu1 %v1366_v17 }
 0x993   :  { %1014 = vmatprep.subr.mxu1 %v1370_v18 }
 0x994   :  { %1015 = vmatpush1.msra.mxu1 %v1374_v19 }
 0xa45   :  { %v840_v2 = vpop.f32.mrf.mxu1 }
 0xa46   :  { %v845_v4 = vadd.f32 %v840_v2, %v189_v0 }
 0xa47   :  { %v842_v5 = vpop.f32.mrf.mxu1 }
 0xa48   :  { %v1130_v6 = vmul.f32 -1.442695, %v845_v4  ;;  %v846_v8 = vadd.f32 %v842_v5, %v191_v3 }
 0xa4a   :  { %1204 = vpow2.f32 %v1130_v6  ;;  %v1131_v10 = vmul.f32 -1.442695, %v846_v8 }
 0xa4c   :  { %1206 = vpow2.f32 %v1131_v10 }
 0xa4d   :  { %1208 = vtanh.f32 %v846_v8 }
 0xa57   :  { %v1205_v12 = vpop.eup %1204 }
 0xa58   :  { %v850_v14 = vadd.f32 1.0, %v1205_v12 }
 0xa59   :  { %v1207_v13 = vpop.eup %1206 }
 0xa5a   :  { %v857_v15 = vadd.f32 1.0, %v1207_v13  ;;  %v1209_v16 = vpop.eup %1208 }
 0xa5c   :  { %1210 = vrcp.f32 %v857_v15 }
 0xa5d   :  { %1212 = vrcp.f32 %v850_v14 }
 0xa69   :  { %v1211_v17 = vpop.eup %1210 }
 0xa6a   :  { %v1213_v18 = vpop.eup %1212  ;;  %v860_v19 = vsel %vm239_vm2, %v1209_v16, %v1211_v17 }
 0xa6b   :  { %v861_v49 = vmul.f32 %v1213_v18, %v860_v19  ;;  %v862_v50 = vmul.f32 %v1213_v18, %v765_v43 }
 0xa6d   :  { %863 = vrot.lane.b32.xlu0 %v861_v49, %s1288_s3 }
 0xadf   :  { %v864_v44 = vpop.permute.xlu0 %863 }
 0xae0   :  { %v865_v55 = vadd.f32 %v864_v44, %v862_v50 }
 0xae2   :  { %1214 = vtanh.f32 %v865_v55 }
 0xaef   :  { %v1215_v56 = vpop.eup %1214 }
 0xaf0   :  { %v867_v1 = vmul.f32 %v1215_v56, %v860_v19 }
 0xaf2   :  { %868 = vrot.lane.b32.xlu1 %v867_v1, %s1288_s3 }
 0xb64   :  { %v869_v57 = vpop.permute.xlu1 %868 }
 0xb65   :  { %v870_v45 = vsel %vm239_vm2, %v869_v57, %v865_v55 }
 0xb66   :  { %1132 = vmatmul.mubr.msk.f32.vlgmr.msra.gmra.mxu0 %vm245_vm3, %v870_v45 }
 0xc26   :  { %v945_v58 = vpop.f32.mrf.mxu0 }
 0xc27   :  { %v950_v60 = vadd.f32 %v945_v58, %v195_v46 }
 0xc28   :  { %v947_v61 = vpop.f32.mrf.mxu0 }
 0xc29   :  { %v1133_v62 = vmul.f32 -1.442695, %v950_v60  ;;  %v951_v63 = vadd.f32 %v947_v61, %v197_v59 }
 0xc2b   :  { %1216 = vpow2.f32 %v1133_v62  ;;  %v1134_v7 = vmul.f32 -1.442695, %v951_v63 }
 0xc2d   :  { %1218 = vpow2.f32 %v1134_v7 }
 0xc2e   :  { %1220 = vtanh.f32 %v951_v63 }
 0xc38   :  { %v1217_v9 = vpop.eup %1216 }
 0xc39   :  { %v955_v20 = vadd.f32 1.0, %v1217_v9 }
 0xc3a   :  { %v1219_v11 = vpop.eup %1218 }
 0xc3b   :  { %v962_v21 = vadd.f32 1.0, %v1219_v11  ;;  %v1221_v22 = vpop.eup %1220 }
 0xc3d   :  { %1222 = vrcp.f32 %v962_v21 }
 0xc3e   :  { %1224 = vrcp.f32 %v955_v20 }
 0xc4a   :  { %v1223_v51 = vpop.eup %1222 }
 0xc4b   :  { %v1225_v23 = vpop.eup %1224  ;;  %v965_v52 = vsel %vm239_vm2, %v1221_v22, %v1223_v51 }
 0xc4c   :  { %v966_v25 = vmul.f32 %v1225_v23, %v965_v52  ;;  %v967_v26 = vmul.f32 %v1225_v23, %v870_v45 }
 0xc4e   :  { %968 = vrot.lane.b32.xlu0 %v966_v25, %s1288_s3 }
 0xcc0   :  { %v969_v27 = vpop.permute.xlu0 %968 }
 0xcc1   :  { %v970_v29 = vadd.f32 %v969_v27, %v967_v26 }
 0xcc3   :  { %1226 = vtanh.f32 %v970_v29 }
 0xcd0   :  { %v1227_v30 = vpop.eup %1226 }
 0xcd1   :  { %v972_v31 = vmul.f32 %v1227_v30, %v965_v52 }
 0xcd3   :  { %973 = vrot.lane.b32.xlu1 %v972_v31, %s1288_s3 }
 0xd45   :  { %v974_v32 = vpop.permute.xlu1 %973 }
 0xd46   :  { %v975_v33 = vsel %vm239_vm2, %v974_v32, %v970_v29 }
 0xd47   :  { %1135 = vmatmul.mubr.msk.f32.vlgmr.msra.gmra.mxu1 %vm245_vm3, %v975_v33 }
 0xe07   :  { %v1050_v34 = vpop.f32.mrf.mxu1 }
 0xe08   :  { %v1055_v35 = vadd.f32 %v1050_v34, %v201_v47 }
 0xe09   :  { %v1052_v36 = vpop.f32.mrf.mxu1 }
 0xe0a   :  { %v1136_v37 = vmul.f32 -1.442695, %v1055_v35  ;;  %v1056_v38 = vadd.f32 %v1052_v36, %v203_v48 }
 0xe0c   :  { %1228 = vpow2.f32 %v1136_v37  ;;  %v1137_v39 = vmul.f32 -1.442695, %v1056_v38 }
 0xe0e   :  { %1230 = vpow2.f32 %v1137_v39 }
 0xe0f   :  { %1232 = vtanh.f32 %v1056_v38 }
 0xe19   :  { %v1229_v40 = vpop.eup %1228 }
 0xe1a   :  { %v1060_v43 = vadd.f32 1.0, %v1229_v40 }
 0xe1b   :  { %v1231_v42 = vpop.eup %1230 }
 0xe1c   :  { %v1067_v0 = vadd.f32 1.0, %v1231_v42  ;;  %v1233_v2 = vpop.eup %1232 }
 0xe1e   :  { %1234 = vrcp.f32 %v1067_v0 }
 0xe1f   :  { %1236 = vrcp.f32 %v1060_v43 }
 0xe2b   :  { %v1235_v24 = vpop.eup %1234 }
 0xe2c   :  { %v1237_v53 = vpop.eup %1236  ;;  %v1070_v28 = vsel %vm239_vm2, %v1233_v2, %v1235_v24 }
 0xe2d   :  { %v1071_v54 = vmul.f32 %v1237_v53, %v1070_v28  ;;  %v1072_v3 = vmul.f32 %v1237_v53, %v975_v33 }
 0xe2f   :  { %1073 = vrot.lane.b32.xlu0 %v1071_v54, %s1288_s3 }
 0xea1   :  { %v1074_v4 = vpop.permute.xlu0 %1073 }
 0xea2   :  { %v1075_v5 = vadd.f32 %v1074_v4, %v1072_v3 }
 0xea4   :  { %1238 = vtanh.f32 %v1075_v5 }
 0xeb1   :  { %v1239_v6 = vpop.eup %1238 }
 0xeb2   :  { %v1077_v8 = vmul.f32 %v1239_v6, %v1070_v28 }
 0xeb4   :  { %1078 = vrot.lane.b32.xlu1 %v1077_v8, %s1288_s3 }
 0xf26   :  { %v1079_v10 = vpop.permute.xlu1 %1078 }
 0xf27   :  { %v1080_v12 = vsel %vm239_vm2, %v1079_v10, %v1075_v5 }
 0xf28   :  { %1081 = vst.msk [vmem:[#allocation6] sm:$0xff] %vm245_vm3, %v1080_v12 }
 0xf29   :  { %1271 = shalt.err (!%p1268_p9)
}
 0xf2a   :  { %1091 = dma.vmem_to_hbm [thread:$0]  %s1089_s14, 128, %s1643_s4, [#allocation5]  }
 0xf2b   :  { %1282 = dma.done.wait [#allocation5], 128  }
 0xf2c   :  { %1283 = vsyncadd [#allocation5], 4294967168 }
 0xf2d   :  { %1095 = vsyncpa [#allocation4], 1 }
 0xf2e   :  { %1096 = vsyncpa [#allocation5], 1 }

</bundles_post_ra>
